<compile_context>
chip_gen: v7x
topology: tpu7x:2x2x1
jax: 0.10.0
libtpu: 0.0.40
codegen_flags: <defaults>
</compile_context>

<pallas_src>
import jax
import jax.numpy as jnp
from jax.experimental import pallas as pl
from jax.experimental.pallas import tpu as pltpu

EPS = 1e-5


def _round_up(a, b):
    return pl.cdiv(a, b) * b


def _gbn_kernel(x_ref, scale_ref, shift_ref, o_ref):
    # x_ref: (block_rows, block_cols); scale/shift: (block_rows, 1) broadcast over cols.
    x = x_ref[...].astype(jnp.float32)
    o_ref[...] = (x * scale_ref[...] + shift_ref[...]).astype(o_ref.dtype)


def gated_batchnorm2d(x, running_mean, running_var, bn_weight, bn_bias, g, bn_mask,
                      target_block_bytes=2 * 1024 * 1024):
    """x: (N, C, H, W).  Per-channel params: (C,).
    Returns (y, area) where y has shape (N, C, H, W) and area = H*W."""
    N, C, H, W = x.shape
    area = H * W
    rows, cols = N * C, H * W

    # ---- Fold BN + gate + mask into per-channel scale/shift (O(C) work) ----
    inv_std = jax.lax.rsqrt(running_var.astype(jnp.float32) + EPS)
    gm = g.astype(jnp.float32) * bn_mask.astype(jnp.float32)
    scale_c = bn_weight.astype(jnp.float32) * inv_std * gm                       # (C,)
    shift_c = (bn_bias.astype(jnp.float32)
               - running_mean.astype(jnp.float32) * bn_weight.astype(jnp.float32) * inv_std) * gm

    # Per-row (row = n*C + c) parameter vectors, shape (N*C, 1).
    scale = jnp.broadcast_to(scale_c[None, :], (N, C)).reshape(rows, 1)
    shift = jnp.broadcast_to(shift_c[None, :], (N, C)).reshape(rows, 1)

    # ---- NCHW-preserving 2D view: (N*C, H*W), channels stay on rows ----
    x2d = x.reshape(rows, cols)

    # ---- Block-size heuristic: lane-dense, ~target_block_bytes per block ----
    cols_128 = _round_up(cols, 128)
    if cols_128 <= 4096:
        block_cols = cols_128                      # whole row in one lane-dense block
    else:
        block_cols = 2048
    target_elems = target_block_bytes // 4         # f32 elements
    block_rows = max(8, min(_round_up(rows, 8), (target_elems // block_cols) // 8 * 8))

    rows_p = _round_up(rows, block_rows)
    cols_p = _round_up(cols, block_cols)

    def _pad2d(a):
        r, c = a.shape
        if (r, c) == (rows_p, c if c == 1 else cols_p):
            return a
        pad_c = 0 if c == 1 else cols_p - c
        return jnp.pad(a, ((0, rows_p - r), (0, pad_c)))

    x2d_p = _pad2d(x2d)
    scale_p = _pad2d(scale)
    shift_p = _pad2d(shift)

    grid = (rows_p // block_rows, cols_p // block_cols)

    y2d_p = pl.pallas_call(
        _gbn_kernel,
        out_shape=jax.ShapeDtypeStruct((rows_p, cols_p), x.dtype),
        grid_spec=pltpu.PrefetchScalarGridSpec(
            num_scalar_prefetch=0,
            grid=grid,
            in_specs=[
                pl.BlockSpec((block_rows, block_cols), lambda i, j: (i, j)),  # x
                pl.BlockSpec((block_rows, 1), lambda i, j: (i, 0)),           # scale
                pl.BlockSpec((block_rows, 1), lambda i, j: (i, 0)),           # shift
            ],
            out_specs=pl.BlockSpec((block_rows, block_cols), lambda i, j: (i, j)),
        ),
        compiler_params=pltpu.CompilerParams(
            dimension_semantics=("parallel", "parallel")),
    )(x2d_p, scale_p, shift_p)

    y = y2d_p[:rows, :cols].reshape(N, C, H, W)
    return y, area


def _reference(x, running_mean, running_var, bn_weight, bn_bias, g, bn_mask):
    rm = running_mean.reshape(1, -1, 1, 1)
    rv = running_var.reshape(1, -1, 1, 1)
    w = bn_weight.reshape(1, -1, 1, 1)
    b = bn_bias.reshape(1, -1, 1, 1)
    gg = g.reshape(1, -1, 1, 1)
    mm = bn_mask.reshape(1, -1, 1, 1)
    y = (x - rm) / jnp.sqrt(rv + EPS) * w + b
    return y * gg * mm


if __name__ == "__main__":
    key = jax.random.PRNGKey(0)
    N, C, H, W = 2, 4, 16, 16

    k_x, k_w, k_b, k_m, k_v = jax.random.split(key, 5)
    x = jax.random.normal(k_x, (N, C, H, W), dtype=jnp.float32)

    # Deterministic synthetic BatchNorm2d state (as after some training).
    orig_weight = jax.random.uniform(k_w, (C,), minval=0.5, maxval=1.5)
    orig_bias = jax.random.normal(k_b, (C,)) * 0.1
    running_mean = jax.random.normal(k_m, (C,)) * 0.1
    running_var = jax.random.uniform(k_v, (C,), minval=0.5, maxval=1.5)

    # Reproduce GatedBatchNorm2d.__init__ + extract_from_bn (plain-JAX glue):
    bn_bias = jnp.clip(orig_bias / orig_weight, -10.0, 10.0)
    g = jnp.ones((C,), jnp.float32) * orig_weight   # g <- g * bn.weight
    bn_weight = jnp.ones((C,), jnp.float32)         # bn.weight <- 1
    bn_mask = jnp.ones((C,), jnp.float32)           # all channels active

    y, area = gated_batchnorm2d(x, running_mean, running_var,
                                bn_weight, bn_bias, g, bn_mask)
    y = jax.block_until_ready(y)

    y_ref = _reference(x, running_mean, running_var, bn_weight, bn_bias, g, bn_mask)
    assert area == H * W
    assert jnp.allclose(y, y_ref, atol=1e-5, rtol=1e-5), "mismatch vs reference"

    # TODO(synk): score / grad-hook bookkeeping (cal_score) is backward-pass
    # state and is not part of the forward kernel.
    print("KERNEL_OK")
</pallas_src>

<mosaic_0001>
module attributes {stable_mosaic.version = 11 : i64} {
  func.func @_gbn_kernel(%arg0: i32, %arg1: i32, %arg2: memref<8x256xf32, #tpu.memory_space<vmem>>, %arg3: memref<8x1xf32, #tpu.memory_space<vmem>>, %arg4: memref<8x1xf32, #tpu.memory_space<vmem>>, %arg5: memref<8x256xf32, #tpu.memory_space<vmem>>) attributes {dimension_semantics = [#tpu.dimension_semantics<parallel>, #tpu.dimension_semantics<parallel>], iteration_bounds = array<i64: 1, 1>, scalar_prefetch = 0 : i64, scratch_operands = 0 : i64, tpu.core_type = #tpu.core_type<tc>, window_params = [{transform_indices = @transform_0, window_bounds = array<i64: 8, 256>}, {transform_indices = @transform_1, window_bounds = array<i64: 8, 1>}, {transform_indices = @transform_2, window_bounds = array<i64: 8, 1>}, {transform_indices = @transform_3, window_bounds = array<i64: 8, 256>}]} {
    %c0 = arith.constant 0 : index
    %c0_0 = arith.constant 0 : index
    %0 = vector.load %arg2[%c0, %c0_0] : memref<8x256xf32, #tpu.memory_space<vmem>>, vector<8x256xf32>
    %c0_1 = arith.constant 0 : index
    %c0_2 = arith.constant 0 : index
    %1 = vector.load %arg3[%c0_1, %c0_2] : memref<8x1xf32, #tpu.memory_space<vmem>>, vector<8x1xf32>
    %2 = vector.broadcast %1 : vector<8x1xf32> to vector<8x256xf32>
    %3 = arith.mulf %0, %2 : vector<8x256xf32>
    %c0_3 = arith.constant 0 : index
    %c0_4 = arith.constant 0 : index
    %4 = vector.load %arg4[%c0_3, %c0_4] : memref<8x1xf32, #tpu.memory_space<vmem>>, vector<8x1xf32>
    %5 = vector.broadcast %4 : vector<8x1xf32> to vector<8x256xf32>
    %6 = arith.addf %3, %5 : vector<8x256xf32>
    %c0_5 = arith.constant 0 : index
    %c0_6 = arith.constant 0 : index
    %7 = vector.load %arg5[%c0_5, %c0_6] : memref<8x256xf32, #tpu.memory_space<vmem>>, vector<8x256xf32>
    tpu.vector_store %arg5[%c0_5, %c0_6], %6 {strides = array<i32>} : memref<8x256xf32, #tpu.memory_space<vmem>>, vector<8x256xf32>,
    return
  }
  func.func @transform_0(%arg0: i32, %arg1: i32) -> (i32, i32) {
    %c0_i32 = arith.constant 0 : i32
    return %arg0, %arg1 : i32, i32
  }
  func.func @transform_1(%arg0: i32, %arg1: i32) -> (i32, i32) {
    %c0_i32 = arith.constant 0 : i32
    %c0_i32_0 = arith.constant 0 : i32
    return %arg0, %c0_i32 : i32, i32
  }
  func.func @transform_2(%arg0: i32, %arg1: i32) -> (i32, i32) {
    %c0_i32 = arith.constant 0 : i32
    %c0_i32_0 = arith.constant 0 : i32
    return %arg0, %c0_i32 : i32, i32
  }
  func.func @transform_3(%arg0: i32, %arg1: i32) -> (i32, i32) {
    %c0_i32 = arith.constant 0 : i32
    return %arg0, %arg1 : i32, i32
  }
}

</mosaic_0001>

<bundles_post_ra>
// kernel: tpu_custom_call.1
= control target key start
LH: loop header
LB: loop body
LE: loop exit
PB: predicated region body
PF: predicated region fallthrough
CT: control target
= control target key end

     0   :  { %s122_s0 = inlined_call_operand.vmem [shape: f32[8,256], index: 0, kind: input, shape index: {}]   ;;  %s123_s1 = inlined_call_operand.vmem [shape: f32[8,1], index: 1, kind: input, shape index: {}]   ;;  %s124_s2 = inlined_call_operand.vmem [shape: f32[8,1], index: 2, kind: input, shape index: {}]   ;;  %s125_s3 = inlined_call_operand.hbm [shape: f32[8,256], index: 3, kind: output, shape index: {}]  }
   0x1   :  { %v17_v0 = vld [vmem:[%s123_s1] sm:$0xff] }
   0x2   :  { %8 = vsyncpa [#allocation3], 0  ;;  %v76_v1 = vmov 0   ;;  %v25_v2 = vld [vmem:[%s124_s2] sm:$0xff]  ;;  %v16_v5 = vld [vmem:[%s122_s0 + $0x8] sm:$0xff]  ;;  %s77_s20 = smov [#allocation2]  }
   0x3   :  { %51 = vset.pattern.permute.xlu0 %v76_v1  ;;  %v15_v4 = vld [vmem:[%s122_s0] sm:$0xff]  ;;  %s41_s1 = sshll.u32 %s77_s20, 4  ;;  %s42_s1 = int_to_ptr.vmem [resolvable:$true] %s41_s1 }
   0x4   :  { %20 = vperm.xlu0 %51, %v17_v0   ;;  %s52_s2 = scalar_lea.vmem %s42_s1, 256  ;;  %p57_p1 = scmp.lt.s32.totalorder %s42_s1, %s42_s1 }
   0x5   :  { %p53_p0 = scmp.ne.s32.totalorder %s42_s1, %s52_s2  ;;  %p58_p2 = scmp.lt.s32.totalorder %s52_s2, %s52_s2 }
   0x7   :  { %p59_p3 = por %p58_p2, %p57_p1 }
   0x8   :  { %28 = vperm.xlu0 %51, %v25_v2  }
   0x9   :  { %p60_p4 = pnand %p59_p3, %p53_p0 }
  0x83   :  { %v21_v3 = vpop.permute.xlu0 %20 }
  0x84   :  { %v23_v6 = vmul.f32 %v21_v3, %v15_v4  ;;  %v24_v7 = vmul.f32 %v21_v3, %v16_v5 }
  0x87   :  { %v29_v8 = vpop.permute.xlu0 %28 }
  0x88   :  { %v31_v9 = vadd.f32 %v29_v8, %v23_v6  ;;  %v32_v10 = vadd.f32 %v29_v8, %v24_v7 }
  0x8a   :  { %33 = vst [vmem:[#allocation2] sm:$0xff] %v31_v9  ;;  %34 = vst [vmem:[#allocation2 + $0x8] sm:$0xff] %v32_v10 }
  0x8b   :  { %63 = shalt.err (!%p60_p4)
}
  0x8c   :  { %s64_s0 = scalar_lea.hbm %s125_s3, 256 }
  0x8d   :  { %p65_p5 = scmp.ne.s32.totalorder %s125_s3, %s64_s0  ;;  %p68_p6 = scmp.lt.u32.totalorder %s64_s0, %s125_s3 }
  0x8f   :  { %p70_p7 = pnand %p68_p6, %p65_p5 }
  0x91   :  { %73 = shalt.err (!%p70_p7)
}
  0x92   :  { %44 = dma.vmem_to_hbm [thread:$0]  %s42_s1, 256, %s125_s3, [#allocation3]  }
  0x93   :  { %74 = dma.done.wait [#allocation3], 256  }
  0x94   :  { %75 = vsyncadd [#allocation3], 4294967040 }
  0x95   :  { %48 = vsyncpa [#allocation3], 1 }

</bundles_post_ra>
